<compile_context>
chip_gen: v7x
topology: tpu7x:2x2x1
jax: 0.10.0
libtpu: 0.0.40
codegen_flags: <defaults>
</compile_context>

<pallas_src>
import functools

import jax
import jax.numpy as jnp
from jax.experimental import pallas as pl
from jax.experimental.pallas import tpu as pltpu


_VMEM_LIMIT = 32 * 1024 * 1024  # safe on v5e/v6e (128 MiB phys) and v7x (64 MiB phys)


def _compiler_params():
    return pltpu.CompilerParams(
        dimension_semantics=("parallel",),
        vmem_limit_bytes=_VMEM_LIMIT,
    )


# ------------------------------- kernels -------------------------------------

def _gcn_kernel(adj_ref, x_ref, w_ref, b_ref, o_ref, *, xw_first):
    """Fused l_GCN row-block: o = adj_rows @ x @ W + b (f32 accumulation)."""
    if xw_first:
        # (N, Cin) @ (Cin, Cout) once per row-block is still cheap at these
        # sizes; chosen only when Cout < Cin so the second matmul shrinks.
        xw = jnp.dot(x_ref[...], w_ref[...], preferred_element_type=jnp.float32)
        h = jnp.dot(adj_ref[...], xw.astype(jnp.bfloat16),
                    preferred_element_type=jnp.float32)
    else:
        # (tm, N) @ (N, Cin) -> (tm, Cin) @ (Cin, Cout); intermediate stays in
        # vregs/VMEM.
        ax = jnp.dot(adj_ref[...], x_ref[...], preferred_element_type=jnp.float32)
        h = jnp.dot(ax.astype(jnp.bfloat16), w_ref[...],
                    preferred_element_type=jnp.float32)
    o_ref[...] = (h + b_ref[...]).astype(o_ref.dtype)


# ------------------------------- wrapper --------------------------------------

def _row_tile(n, tm=128):
    # >= 2 row blocks when possible (lets v7x shard across its 2 TensorCores);
    # fall back to one full block for non-multiple shapes.
    return tm if n % tm == 0 else n


def l_gcn(x, adj_norm, W, b, tm=128):
    """l_GCN.forward: adj_norm @ x @ W + b, as ONE fused pallas_call."""
    N = adj_norm.shape[0]
    Cin = x.shape[1]
    Cout = W.shape[1]
    assert x.shape[0] == N and W.shape[0] == Cin and b.shape[-1] == Cout

    tm = _row_tile(N, tm)
    xw_first = Cout < Cin  # static: pick the cheaper matmul association

    return pl.pallas_call(
        functools.partial(_gcn_kernel, xw_first=xw_first),
        out_shape=jax.ShapeDtypeStruct((N, Cout), jnp.float32),
        grid_spec=pltpu.PrefetchScalarGridSpec(
            num_scalar_prefetch=0,
            grid=(N // tm,),
            in_specs=[
                pl.BlockSpec((tm, N), lambda i: (i, 0)),      # adjacency row block
                pl.BlockSpec((N, Cin), lambda i: (0, 0)),     # full node features
                pl.BlockSpec((Cin, Cout), lambda i: (0, 0)),  # full weight
                pl.BlockSpec((1, Cout), lambda i: (0, 0)),    # bias (f32)
            ],
            out_specs=pl.BlockSpec((tm, Cout), lambda i: (i, 0)),
        ),
        compiler_params=_compiler_params(),
    )(
        adj_norm.astype(jnp.bfloat16),
        x.astype(jnp.bfloat16),
        W.astype(jnp.bfloat16),
        jnp.asarray(b, jnp.float32).reshape(1, Cout),
    )


def l_gcn_reference(x, adj_norm, W, b):
    """Pure-JAX f32 reference matching the PyTorch module semantics."""
    return adj_norm @ x @ W + b


# --------------------------- setup (params / graph) ---------------------------

def glorot(key, shape):
    fan_in, fan_out = shape
    a = (6.0 / (fan_in + fan_out)) ** 0.5
    return jax.random.uniform(key, shape, jnp.float32, -a, a)


def make_graph(key, n_nodes, p=0.05):
    """Random symmetric adjacency with self-loops + D^-1/2 A D^-1/2 (as in the spec)."""
    a = (jax.random.uniform(key, (n_nodes, n_nodes)) < p).astype(jnp.float32)
    adj0 = jnp.maximum(a, a.T)                      # symmetric edges
    adj0 = jnp.maximum(adj0, jnp.eye(n_nodes))      # self-loops -> deg >= 1
    deg = adj0.sum(axis=1)
    dis = deg ** -0.5
    return dis[:, None] * adj0 * dis[None, :]       # D^-1/2 A D^-1/2


if __name__ == "__main__":
    key = jax.random.PRNGKey(0)

    N_NODES = 256
    IN_CHANNELS = 32
    HIDDEN = 128

    key, kx, kg, kw1, kw2 = jax.random.split(key, 5)
    x = jax.random.normal(kx, (N_NODES, IN_CHANNELS), jnp.float32)
    adj_norm = make_graph(kg, N_NODES)

    # Layer A: 32 -> 128  (exercises the adj@x-first path)
    W1 = glorot(kw1, (IN_CHANNELS, HIDDEN))
    b1 = jnp.zeros((HIDDEN,), jnp.float32)
    # Layer B: 128 -> 32  (exercises the x@W-first path)
    W2 = glorot(kw2, (HIDDEN, IN_CHANNELS))
    b2 = jnp.zeros((IN_CHANNELS,), jnp.float32)

    gcn = jax.jit(l_gcn)

    out1 = jax.block_until_ready(gcn(x, adj_norm, W1, b1))
    out2 = jax.block_until_ready(gcn(out1, adj_norm, W2, b2))

    ref1 = l_gcn_reference(x, adj_norm, W1, b1)
    ref2 = l_gcn_reference(ref1, adj_norm, W2, b2)

    assert out1.shape == (N_NODES, HIDDEN), out1.shape
    assert out2.shape == (N_NODES, IN_CHANNELS), out2.shape
    assert bool(jnp.all(jnp.isfinite(out1))) and bool(jnp.all(jnp.isfinite(out2)))

    def rel_err(a, b):
        return float(jnp.linalg.norm(a - b) / (jnp.linalg.norm(b) + 1e-6))

    # bf16 MXU inputs with f32 accumulation: expect ~1e-2 relative error.
    e1, e2 = rel_err(out1, ref1), rel_err(out2, ref2)
    assert e1 < 5e-2, e1
    assert e2 < 5e-2, e2

    print("KERNEL_OK")
</pallas_src>

<mosaic_0001>
module attributes {stable_mosaic.version = 11 : i64} {
  func.func @_gcn_kernel(%arg0: i32, %arg1: memref<128x256xbf16, #tpu.memory_space<vmem>>, %arg2: memref<256x32xbf16, #tpu.memory_space<vmem>>, %arg3: memref<32x128xbf16, #tpu.memory_space<vmem>>, %arg4: memref<1x128xf32, #tpu.memory_space<vmem>>, %arg5: memref<128x128xf32, #tpu.memory_space<vmem>>) attributes {dimension_semantics = [#tpu.dimension_semantics<parallel>], iteration_bounds = array<i64: 2>, scalar_prefetch = 0 : i64, scratch_operands = 0 : i64, tpu.core_type = #tpu.core_type<tc>, window_params = [{transform_indices = @transform_0, window_bounds = array<i64: 128, 256>}, {pipeline_mode = #tpu.pipeline_mode<synchronous>, transform_indices = @transform_1, window_bounds = array<i64: 256, 32>}, {pipeline_mode = #tpu.pipeline_mode<synchronous>, transform_indices = @transform_2, window_bounds = array<i64: 32, 128>}, {pipeline_mode = #tpu.pipeline_mode<synchronous>, transform_indices = @transform_3, window_bounds = array<i64: 1, 128>}, {transform_indices = @transform_4, window_bounds = array<i64: 128, 128>}]} {
    %c0 = arith.constant 0 : index
    %c0_0 = arith.constant 0 : index
    %0 = vector.load %arg1[%c0, %c0_0] : memref<128x256xbf16, #tpu.memory_space<vmem>>, vector<128x256xbf16>
    %c0_1 = arith.constant 0 : index
    %c0_2 = arith.constant 0 : index
    %1 = vector.load %arg2[%c0_1, %c0_2] : memref<256x32xbf16, #tpu.memory_space<vmem>>, vector<256x32xbf16>
    %cst = arith.constant dense<0.000000e+00> : vector<128x32xf32>
    %2 = tpu.matmul %0, %1, %cst {dimension_numbers = #tpu.dot_dimension_numbers<[1], [0], [0], [1], [0, 0, 1, 1], [], []>} : vector<128x256xbf16>, vector<256x32xbf16>, vector<128x32xf32> -> vector<128x32xf32>
    %3 = arith.truncf %2 : vector<128x32xf32> to vector<128x32xbf16>
    %c0_3 = arith.constant 0 : index
    %c0_4 = arith.constant 0 : index
    %4 = vector.load %arg3[%c0_3, %c0_4] : memref<32x128xbf16, #tpu.memory_space<vmem>>, vector<32x128xbf16>
    %cst_5 = arith.constant dense<0.000000e+00> : vector<128x128xf32>
    %5 = tpu.matmul %3, %4, %cst_5 {dimension_numbers = #tpu.dot_dimension_numbers<[1], [0], [0], [1], [0, 0, 1, 1], [], []>} : vector<128x32xbf16>, vector<32x128xbf16>, vector<128x128xf32> -> vector<128x128xf32>
    %c0_6 = arith.constant 0 : index
    %c0_7 = arith.constant 0 : index
    %6 = vector.load %arg4[%c0_6, %c0_7] : memref<1x128xf32, #tpu.memory_space<vmem>>, vector<1x128xf32>
    %7 = vector.broadcast %6 : vector<1x128xf32> to vector<128x128xf32>
    %8 = arith.addf %5, %7 : vector<128x128xf32>
    %c0_8 = arith.constant 0 : index
    %c0_9 = arith.constant 0 : index
    %9 = vector.load %arg5[%c0_8, %c0_9] : memref<128x128xf32, #tpu.memory_space<vmem>>, vector<128x128xf32>
    tpu.vector_store %arg5[%c0_8, %c0_9], %8 {strides = array<i32>} : memref<128x128xf32, #tpu.memory_space<vmem>>, vector<128x128xf32>,
    return
  }
  func.func @transform_0(%arg0: i32) -> (i32, i32) {
    %c0_i32 = arith.constant 0 : i32
    %c0_i32_0 = arith.constant 0 : i32
    return %arg0, %c0_i32 : i32, i32
  }
  func.func @transform_1(%arg0: i32) -> (i32, i32) {
    %c0_i32 = arith.constant 0 : i32
    %c0_i32_0 = arith.constant 0 : i32
    %c0_i32_1 = arith.constant 0 : i32
    return %c0_i32, %c0_i32_0 : i32, i32
  }
  func.func @transform_2(%arg0: i32) -> (i32, i32) {
    %c0_i32 = arith.constant 0 : i32
    %c0_i32_0 = arith.constant 0 : i32
    %c0_i32_1 = arith.constant 0 : i32
    return %c0_i32, %c0_i32_0 : i32, i32
  }
  func.func @transform_3(%arg0: i32) -> (i32, i32) {
    %c0_i32 = arith.constant 0 : i32
    %c0_i32_0 = arith.constant 0 : i32
    %c0_i32_1 = arith.constant 0 : i32
    return %c0_i32, %c0_i32_0 : i32, i32
  }
  func.func @transform_4(%arg0: i32) -> (i32, i32) {
    %c0_i32 = arith.constant 0 : i32
    %c0_i32_0 = arith.constant 0 : i32
    return %arg0, %c0_i32 : i32, i32
  }
}

</mosaic_0001>

<bundles_post_ra>
// kernel: l_gcn.1
= control target key start
LH: loop header
LB: loop body
LE: loop exit
PB: predicated region body
PF: predicated region fallthrough
CT: control target
= control target key end

     0   :  { %9 = vsyncpa [#allocation3], 0  ;;  %s1320_s0 = inlined_call_operand.vmem [shape: bf16[256,256], index: 0, kind: input, shape index: {}]   ;;  %s1321_s1 = inlined_call_operand.vmem [shape: bf16[256,32], index: 1, kind: input, shape index: {}]   ;;  %s1322_s2 = inlined_call_operand.vmem [shape: bf16[32,128], index: 2, kind: input, shape index: {}]   ;;  %s1323_s3 = inlined_call_operand.vmem [shape: f32[1,128], index: 3, kind: input, shape index: {}]   ;;  %s1324_s4 = inlined_call_operand.hbm [shape: f32[256,128], index: 4, kind: output, shape index: {}]  }
   0x1   :  { %11 = vsyncpa [#allocation3 + $0x1], 0  ;;  %s1112_s15 = smov 0   ;;  %s1114_s16 = smov 0  }
   0x2   :  { %s1116_s17 = smov 0   ;;  %s1118_s18 = smov 0  }
   0x3 LB: > { %s1133_s19 = sadd.s32 4294967295, %s1082_s18   ;;  %s769_s20 = sadd.s32 4294967294, %s1082_s18   ;;  %s1082_s18 = sphi %s1118_s18, %s1330_s18   ;;  %s1078_s17 = sphi %s1116_s17, %s1329_s17   ;;  %s1074_s16 = sphi %s1114_s16, %s1328_s16   ;;  %s1070_s15 = sphi %s1112_s15, %s1327_s15  }
   0x4   : > { %s1137_s21 = sadd.s32 1, %s1082_s18   ;;  %s113_s22 = sadd.s32 1, %s1078_s17 }
   0x5   : > { %s110_s23 = ssub.s32 %s1082_s18, %s1137_s21  ;;  %p123_p0 = scmp.ne.s32.totalorder %s1078_s17, %s1074_s16 }
   0x6   : > { %p111_p1 = scmp.eq.s32.totalorder %s110_s23, 0  ;;  %p124_p2 = scmp.eq.s32.totalorder %s1133_s19, 1 }
   0x7   : > { %p129_p3 = scmp.ne.s32.totalorder %s1074_s16, %s1070_s15  ;;  %p130_p4 = scmp.eq.s32.totalorder %s769_s20, 1 }
   0x8   : > { %s1148_s24 = scalar_select %p111_p1, %s1078_s17, %s113_s22  }
   0x9   : > { %p1150_p5 = por %p124_p2, %p123_p0  ;;  %p1154_p6 = por %p130_p4, %p129_p3 }
   0xa   : > { %p772_p7 = scmp.ge.s32.totalorder %s1082_s18, 1  ;;  %p167_p8 = scmp.lt.s32.totalorder %s1082_s18, 3 }
   0xc   : > { %p168_p9 = pnand %p772_p7, %p167_p8 }
   0xd   : > { %v978_v0 = vld [vmem:[%s1321_s1 + $0x40] sm:$0xff] (!%p168_p9)   ;;  %s774_s29 = sshll.u32 (!%p168_p9), %s1133_s19, 4  ;;  %v980_v2 = vld [vmem:[%s1321_s1 + $0x48] sm:$0xff] (!%p168_p9)   ;;  %v982_v4 = vld [vmem:[%s1321_s1 + $0x50] sm:$0xff] (!%p168_p9)   ;;  %vm555_vm0 = vcmask (!%p168_p9), 261120   ;;  %s826_s13 = sshll.u32 (!%p168_p9), %s1133_s19, 11 }
   0xe   : > { %171 = sbr.rel (%p168_p9) target bundleno = 545 (0x221), region = 36  ;;  %v979_v1 = vld [vmem:[%s1321_s1] sm:$0xff] (!%p168_p9)   ;;  %827 = vmatprep.subr.bf16.mxu0 (!%p168_p9), %v978_v0  ;;  %921 = vmatprep.subr.bf16.mxu1 (!%p168_p9), %v978_v0  ;;  %v981_v3 = vld [vmem:[%s1321_s1 + $0x8] sm:$0xff] (!%p168_p9)   ;;  %p195_p10 = scmp.lt.s32.totalorder (!%p168_p9), %s774_s29, 31  ;;  %v983_v5 = vld [vmem:[%s1321_s1 + $0x10] sm:$0xff] (!%p168_p9)  }
   0xf   : > { %828 = vmatpush3.bf16.msra.mxu0 (!%p168_p9), %v979_v1  ;;  %929 = vmatpush3.bf16.msra.mxu1 (!%p168_p9), %v979_v1  ;;  %v984_v6 = vld [vmem:[%s1321_s1 + $0x58] sm:$0xff] (!%p168_p9)   ;;  %v986_v8 = vld [vmem:[%s1321_s1 + $0x60] sm:$0xff] (!%p168_p9)   ;;  %v988_v10 = vld [vmem:[%s1321_s1 + $0x68] sm:$0xff] (!%p168_p9)   ;;  %s1270_s23 = scalar_lea.hbm (!%p168_p9), %s1324_s4, %s826_s13  ;;  %s1084_s28 = smov (!%p168_p9), [#allocation2]  }
  0x10   : > { %829 = vmatprep.subr.bf16.mxu0 (!%p168_p9), %v980_v2  ;;  %922 = vmatprep.subr.bf16.mxu1 (!%p168_p9), %v980_v2  ;;  %v985_v7 = vld [vmem:[%s1321_s1 + $0x18] sm:$0xff] (!%p168_p9)   ;;  %v987_v9 = vld [vmem:[%s1321_s1 + $0x20] sm:$0xff] (!%p168_p9)   ;;  %v989_v12 = vld [vmem:[%s1321_s1 + $0x28] sm:$0xff] (!%p168_p9)   ;;  %s1024_s30 = sshll.u32 (!%p168_p9), %s1084_s28, 4  ;;  %s1025_s30 = int_to_ptr.vmem [resolvable:$false] %s1024_s30 }
  0x11   : > { %v990_v13 = vld [vmem:[%s1321_s1 + $0x70] sm:$0xff] (!%p168_p9)   ;;  %v992_v16 = vld [vmem:[%s1321_s1 + $0x78] sm:$0xff] (!%p168_p9)   ;;  %v1018_v32 = vld [vmem:[%s1322_s2] sm:$0xff] (!%p168_p9)   ;;  %s1026_s5 = scalar_lea.vmem (!%p168_p9), %s1025_s30, 4096 }
  0x12   : > { %v991_v14 = vld [vmem:[%s1321_s1 + $0x30] sm:$0xff] (!%p168_p9)   ;;  %v993_v17 = vld [vmem:[%s1321_s1 + $0x38] sm:$0xff] (!%p168_p9)   ;;  %v1019_v33 = vld [vmem:[%s1322_s2 + $0x8] sm:$0xff] (!%p168_p9)  }
  0x13   : > { %830 = vmatpush3.bf16.msra.mxu0 (!%p168_p9), %v981_v3  ;;  %930 = vmatpush3.bf16.msra.mxu1 (!%p168_p9), %v981_v3 }
  0x14   : > { %831 = vmatprep.subr.bf16.mxu0 (!%p168_p9), %v982_v4  ;;  %923 = vmatprep.subr.bf16.mxu1 (!%p168_p9), %v982_v4 }
  0x15   : > { %s1332_s29 = smov (!%p195_p10, %s774_s29), 31 }
  0x16   : > { %s825_s27 = sshll.u32 %s1332_s29, 3 }
  0x17   : > { %832 = vmatpush3.bf16.msra.mxu0 %v983_v5  ;;  %931 = vmatpush3.bf16.msra.mxu1 %v983_v5  ;;  %s1191_s7 = scalar_lea.vmem %s1320_s0, %s825_s27 }
  0x18   : > { %833 = vmatprep.subr.bf16.mxu0 %v984_v6  ;;  %924 = vmatprep.subr.bf16.mxu1 %v984_v6  ;;  %v996_v11 = vld [vmem:[%s1191_s7 + $0x4] ss:$8 sps:$4 sm:$0xff]   ;;  %v994_v18 = vld [vmem:[%s1191_s7] ss:$8 sps:$4 sm:$0xff]   ;;  %v997_v19 = vld [vmem:[%s1191_s7 + $0x14] ss:$8 sps:$4 sm:$0xff]  }
  0x19   : > { %459 = vmatprep.mubr.bf16.mxu0 %v996_v11  ;;  %v1011_v15 = vld [vmem:[%s1191_s7 + $0x64] ss:$8 sps:$4 sm:$0xff]   ;;  %v1009_v20 = vld [vmem:[%s1191_s7 + $0x60] ss:$8 sps:$4 sm:$0xff]   ;;  %v1015_v21 = vld [vmem:[%s1191_s7 + $0x74] ss:$8 sps:$4 sm:$0xff]  }
  0x1a   : > { %507 = vmatprep.mubr.bf16.mxu1 %v1011_v15  ;;  %v999_v22 = vld [vmem:[%s1191_s7 + $0x10] ss:$8 sps:$4 sm:$0xff]   ;;  %v1000_v23 = vld [vmem:[%s1191_s7 + $0x24] ss:$8 sps:$4 sm:$0xff]   ;;  %v1002_v25 = vld [vmem:[%s1191_s7 + $0x20] ss:$8 sps:$4 sm:$0xff]  }
  0x1b   : > { %834 = vmatpush3.bf16.msra.mxu0 %v985_v7  ;;  %932 = vmatpush3.bf16.msra.mxu1 %v985_v7  ;;  %v1017_v24 = vld [vmem:[%s1191_s7 + $0x70] ss:$8 sps:$4 sm:$0xff]   ;;  %v1003_v26 = vld [vmem:[%s1191_s7 + $0x34] ss:$8 sps:$4 sm:$0xff]   ;;  %v1006_v28 = vld [vmem:[%s1191_s7 + $0x44] ss:$8 sps:$4 sm:$0xff]  }
  0x1c   : > { %835 = vmatprep.subr.bf16.mxu0 %v986_v8  ;;  %925 = vmatprep.subr.bf16.mxu1 %v986_v8  ;;  %v1005_v27 = vld [vmem:[%s1191_s7 + $0x30] ss:$8 sps:$4 sm:$0xff]   ;;  %v1008_v29 = vld [vmem:[%s1191_s7 + $0x40] ss:$8 sps:$4 sm:$0xff]   ;;  %v1012_v30 = vld [vmem:[%s1191_s7 + $0x54] ss:$8 sps:$4 sm:$0xff]  }
  0x1d   : > { %v1014_v31 = vld [vmem:[%s1191_s7 + $0x50] ss:$8 sps:$4 sm:$0xff]   ;;  %s191_s7 = sand.u32 1, %s1074_s16  }
  0x1e   : > { %s773_s29 = sshll.u32 %s191_s7, 7  ;;  %s1279_s19 = scalar_lea.sflag [#allocation3], %s191_s7 }
  0x1f   : > { %836 = vmatpush3.bf16.msra.mxu0 %v987_v9  ;;  %933 = vmatpush3.bf16.msra.mxu1 %v987_v9  ;;  %s1250_s12 = scalar_lea.vmem [#allocation2], %s773_s29 }
  0x20   : > { %837 = vmatprep.subr.bf16.mxu0 %v988_v10  ;;  %926 = vmatprep.subr.bf16.mxu1 %v988_v10  ;;  %s707_s14 = sshll.u32 %s1250_s12, 4  ;;  %s1272_s14 = int_to_ptr.vmem [resolvable:$true] %s707_s14 }
  0x21   : > { %s1020_s27 = scalar_lea.vmem %s1272_s14, 2048  ;;  %p1027_p0 = scmp.lt.s32.totalorder %s1272_s14, %s1025_s30 }
  0x22   : > { %p1021_p11 = scmp.ne.s32.totalorder %s1272_s14, %s1020_s27  ;;  %p1028_p1 = scmp.lt.s32.totalorder %s1026_s5, %s1020_s27 }
  0x23   : > { %838 = vmatpush3.bf16.msra.mxu0 %v989_v12  ;;  %934 = vmatpush3.bf16.msra.mxu1 %v989_v12 }
  0x24   : > { %839 = vmatprep.subr.bf16.mxu0 %v990_v13  ;;  %927 = vmatprep.subr.bf16.mxu1 %v990_v13  ;;  %p1022_p12 = pnand %p1021_p11, %p1150_p5  ;;  %p1029_p2 = por %p1028_p1, %p1027_p0 }
  0x26   : > { %p1023_p13 = pneg %p1022_p12 }
  0x27   : > { %840 = vmatpush3.bf16.msra.mxu0 %v991_v14  ;;  %935 = vmatpush3.bf16.msra.mxu1 %v991_v14 }
  0x28   : > { %841 = vmatprep.subr.bf16.mxu0 %v992_v16  ;;  %928 = vmatprep.subr.bf16.mxu1 %v992_v16  ;;  %p1030_p3 = pnand %p1029_p2, %p1023_p13 }
  0x2b   : > { %842 = vmatpush3.bf16.msra.mxu0 %v993_v17  ;;  %936 = vmatpush3.bf16.msra.mxu1 %v993_v17 }
  0x2c   : > { %901 = vmatprep.subr.bf16.mxu1 %v1018_v32 }
  0x2e   : > { %460 = vmatmul.mubr.bf16.vlgmr.msra.gmra.mrb[0].mxu0 %v994_v18  ;;  %508 = vmatmul.mubr.bf16.vlgmr.msra.gmra.mrb[0].mxu1 %v1009_v20 }
  0x2f   : > { %467 = vmatprep.mubr.bf16.mxu0 %v997_v19  ;;  %515 = vmatprep.mubr.bf16.mxu1 %v1015_v21 }
  0x30   : > { %902 = vmatpush3.bf16.msra.mxu1 %v1018_v32 }
  0x31   : > { %903 = vmatprep.subr.bf16.mxu1 %v1019_v33 }
  0x34   : > { %904 = vmatpush3.bf16.msra.mxu1 %v1019_v33 }
  0x36   : > { %468 = vmatmul.mubr.bf16.gmra.mrb[4].mxu0 %v999_v22  ;;  %516 = vmatmul.mubr.bf16.gmra.mrb[4].mxu1 %v1017_v24 }
  0x37   : > { %475 = vmatprep.mubr.bf16.mxu0 %v1000_v23 }
  0x3e   : > { %476 = vmatmul.mubr.bf16.gmra.mrb[8].mxu0 %v1002_v25 }
  0x3f   : > { %483 = vmatprep.mubr.bf16.mxu0 %v1003_v26  ;;  %v809_v26 = vld [vmem:[%s1323_s3] ss:$0 sm:$0xff] }
  0x46   : > { %484 = vmatmul.mubr.bf16.gmra.mrb[12].mxu0 %v1005_v27 }
  0x47   : > { %491 = vmatprep.mubr.bf16.mxu0 %v1006_v28 }
  0x4e   : > { %492 = vmatmul.mubr.bf16.gmra.mrb[16].mxu0 %v1008_v29 }
  0x4f   : > { %499 = vmatprep.mubr.bf16.mxu0 %v1012_v30 }
  0x56   : > { %500 = vmatmul.mubr.bf16.gmra.mrb[20].mxu0 %v1014_v31 }
 0x101   : > { %v843_v34 = vpop.f32.mrb[0].mxu0  ;;  %v879_v36 = vpop.f32.mrb[0].mxu1 }
 0x102   : > { %v844_v35 = vpop.f32.mrb[1].mxu0  ;;  %v880_v39 = vpop.f32.mrb[1].mxu1 }
 0x103   : > { %v845_v37 = vadd.f32 %v844_v35, %v843_v34  ;;  %v846_v38 = vpop.f32.mrb[2].mxu0  ;;  %v881_v41 = vadd.f32 %v880_v39, %v879_v36  ;;  %v882_v42 = vpop.f32.mrb[2].mxu1 }
 0x104   : > { %v847_v40 = vpop.f32.mrb[3].mxu0  ;;  %v883_v44 = vpop.f32.mrb[3].mxu1 }
 0x105   : > { %v848_v43 = vadd.f32 %v847_v40, %v846_v38  ;;  %v884_v45 = vadd.f32 %v883_v44, %v882_v42 }
 0x107   : > { %v524_v46 = vpack.c.bf16 %v848_v43, %v845_v37  ;;  %v530_v47 = vpack.c.bf16 %v884_v45, %v881_v41 }
 0x109   : > { %v849_v48 = vpop.f32.mrb[4].mxu0  ;;  %905 = vmatprep.mubr.msk.bf16.mxu1 %vm555_vm0, %v524_v46  ;;  %v885_v50 = vpop.f32.mrb[4].mxu1 }
 0x10a   : > { %v850_v49 = vpop.f32.mrb[5].mxu0  ;;  %v886_v53 = vpop.f32.mrb[5].mxu1 }
 0x10b   : > { %v851_v51 = vadd.f32 %v850_v49, %v849_v48  ;;  %v852_v52 = vpop.f32.mrb[6].mxu0  ;;  %v887_v55 = vadd.f32 %v886_v53, %v885_v50  ;;  %v888_v56 = vpop.f32.mrb[6].mxu1 }
 0x10c   : > { %v853_v54 = vpop.f32.mrb[7].mxu0  ;;  %v889_v58 = vpop.f32.mrb[7].mxu1 }
 0x10d   : > { %v854_v57 = vadd.f32 %v853_v54, %v852_v52  ;;  %v890_v59 = vadd.f32 %v889_v58, %v888_v56 }
 0x10f   : > { %v525_v60 = vpack.c.bf16 %v854_v57, %v851_v51  ;;  %v531_v61 = vpack.c.bf16 %v890_v59, %v887_v55 }
 0x111   : > { %v855_v62 = vpop.f32.mrb[8].mxu0  ;;  %906 = vmatmul.mubr.msk.bf16.vlgmr.msra.gmra.mrb[8].mxu1 %vm555_vm0, %v525_v60 }
 0x112   : > { %v856_v63 = vpop.f32.mrb[9].mxu0 }
 0x113   : > { %v857_v0 = vadd.f32 %v856_v63, %v855_v62  ;;  %v858_v1 = vpop.f32.mrb[10].mxu0 }
 0x114   : > { %v859_v2 = vpop.f32.mrb[11].mxu0 }
 0x115   : > { %v860_v3 = vadd.f32 %v859_v2, %v858_v1 }
 0x117   : > { %v526_v4 = vpack.c.bf16 %v860_v3, %v857_v0 }
 0x119   : > { %v861_v5 = vpop.f32.mrb[12].mxu0  ;;  %909 = vmatprep.mubr.msk.bf16.mxu1 %vm555_vm0, %v526_v4 }
 0x11a   : > { %v862_v6 = vpop.f32.mrb[13].mxu0 }
 0x11b   : > { %v863_v7 = vadd.f32 %v862_v6, %v861_v5  ;;  %v864_v8 = vpop.f32.mrb[14].mxu0 }
 0x11c   : > { %v865_v9 = vpop.f32.mrb[15].mxu0 }
 0x11d   : > { %v866_v10 = vadd.f32 %v865_v9, %v864_v8 }
 0x11f   : > { %v527_v11 = vpack.c.bf16 %v866_v10, %v863_v7 }
 0x121   : > { %v867_v12 = vpop.f32.mrb[16].mxu0  ;;  %910 = vmatmul.mubr.msk.bf16.gmra.mrb[12].mxu1 %vm555_vm0, %v527_v11 }
 0x122   : > { %v868_v13 = vpop.f32.mrb[17].mxu0 }
 0x123   : > { %v869_v14 = vadd.f32 %v868_v13, %v867_v12  ;;  %v870_v15 = vpop.f32.mrb[18].mxu0 }
 0x124   : > { %v871_v16 = vpop.f32.mrb[19].mxu0 }
 0x125   : > { %v872_v17 = vadd.f32 %v871_v16, %v870_v15 }
 0x127   : > { %v528_v18 = vpack.c.bf16 %v872_v17, %v869_v14 }
 0x129   : > { %v873_v19 = vpop.f32.mrb[20].mxu0  ;;  %913 = vmatprep.mubr.msk.bf16.mxu1 %vm555_vm0, %v528_v18 }
 0x12a   : > { %v874_v20 = vpop.f32.mrb[21].mxu0 }
 0x12b   : > { %v875_v21 = vadd.f32 %v874_v20, %v873_v19  ;;  %v876_v22 = vpop.f32.mrb[22].mxu0 }
 0x12c   : > { %v877_v23 = vpop.f32.mrb[23].mxu0 }
 0x12d   : > { %v878_v24 = vadd.f32 %v877_v23, %v876_v22 }
 0x12f   : > { %v529_v25 = vpack.c.bf16 %v878_v24, %v875_v21 }
 0x131   : > { %914 = vmatmul.mubr.msk.bf16.gmra.mrb[16].mxu1 %vm555_vm0, %v529_v25 }
 0x132   : > { %917 = vmatprep.mubr.msk.bf16.mxu1 %vm555_vm0, %v530_v47 }
 0x139   : > { %918 = vmatmul.mubr.msk.bf16.gmra.mrb[20].mxu1 %vm555_vm0, %v531_v61 }
 0x1e4   : > { %v907_v27 = vpop.f32.mrb[8].mxu1 }
 0x1e5   : > { %v623_v28 = vadd.f32 %v907_v27, %v809_v26  ;;  %v614_v29 = vpop.f32.mrb[9].mxu1 }
 0x1e6   : > { %v615_v30 = vadd.f32 %v809_v26, %v614_v29  ;;  %v908_v31 = vpop.f32.mrb[10].mxu1 }
 0x1e7   : > { %679 = vst [vmem:[%s1250_s12 + $0x10] sm:$0xff] %v623_v28  ;;  %v626_v32 = vadd.f32 %v908_v31, %v809_v26  ;;  %v617_v33 = vpop.f32.mrb[11].mxu1 }
 0x1e8   : > { %677 = vst [vmem:[%s1250_s12] sm:$0xff] %v615_v30  ;;  %v618_v34 = vadd.f32 %v809_v26, %v617_v33 }
 0x1e9   : > { %680 = vst [vmem:[%s1250_s12 + $0x18] sm:$0xff] %v626_v32 }
 0x1ea   : > { %678 = vst [vmem:[%s1250_s12 + $0x8] sm:$0xff] %v618_v34 }
 0x1f4   : > { %v911_v35 = vpop.f32.mrb[12].mxu1 }
 0x1f5   : > { %v639_v36 = vadd.f32 %v911_v35, %v809_v26  ;;  %v630_v37 = vpop.f32.mrb[13].mxu1 }
 0x1f6   : > { %v631_v38 = vadd.f32 %v809_v26, %v630_v37  ;;  %v912_v39 = vpop.f32.mrb[14].mxu1 }
 0x1f7   : > { %683 = vst [vmem:[%s1250_s12 + $0x30] sm:$0xff] %v639_v36  ;;  %v642_v40 = vadd.f32 %v912_v39, %v809_v26  ;;  %v633_v41 = vpop.f32.mrb[15].mxu1 }
 0x1f8   : > { %681 = vst [vmem:[%s1250_s12 + $0x20] sm:$0xff] %v631_v38  ;;  %v634_v42 = vadd.f32 %v809_v26, %v633_v41 }
 0x1f9   : > { %684 = vst [vmem:[%s1250_s12 + $0x38] sm:$0xff] %v642_v40 }
 0x1fa   : > { %682 = vst [vmem:[%s1250_s12 + $0x28] sm:$0xff] %v634_v42 }
 0x204   : > { %v915_v43 = vpop.f32.mrb[16].mxu1 }
 0x205   : > { %v655_v44 = vadd.f32 %v915_v43, %v809_v26  ;;  %v646_v45 = vpop.f32.mrb[17].mxu1 }
 0x206   : > { %v647_v46 = vadd.f32 %v809_v26, %v646_v45  ;;  %v916_v47 = vpop.f32.mrb[18].mxu1 }
 0x207   : > { %687 = vst [vmem:[%s1250_s12 + $0x50] sm:$0xff] %v655_v44  ;;  %v658_v48 = vadd.f32 %v916_v47, %v809_v26  ;;  %v649_v49 = vpop.f32.mrb[19].mxu1 }
 0x208   : > { %685 = vst [vmem:[%s1250_s12 + $0x40] sm:$0xff] %v647_v46  ;;  %v650_v50 = vadd.f32 %v809_v26, %v649_v49 }
 0x209   : > { %688 = vst [vmem:[%s1250_s12 + $0x58] sm:$0xff] %v658_v48 }
 0x20a   : > { %686 = vst [vmem:[%s1250_s12 + $0x48] sm:$0xff] %v650_v50 }
 0x20c   : > { %v919_v51 = vpop.f32.mrb[20].mxu1 }
 0x20d   : > { %v671_v52 = vadd.f32 %v919_v51, %v809_v26  ;;  %v662_v53 = vpop.f32.mrb[21].mxu1 }
 0x20e   : > { %v663_v54 = vadd.f32 %v809_v26, %v662_v53  ;;  %v920_v55 = vpop.f32.mrb[22].mxu1 }
 0x20f   : > { %691 = vst [vmem:[%s1250_s12 + $0x70] sm:$0xff] %v671_v52  ;;  %v674_v56 = vadd.f32 %v920_v55, %v809_v26  ;;  %v665_v57 = vpop.f32.mrb[23].mxu1 }
 0x210   : > { %689 = vst [vmem:[%s1250_s12 + $0x60] sm:$0xff] %v663_v54  ;;  %v666_v58 = vadd.f32 %v809_v26, %v665_v57 }
 0x211   : > { %692 = vst [vmem:[%s1250_s12 + $0x78] sm:$0xff] %v674_v56 }
 0x212   : > { %690 = vst [vmem:[%s1250_s12 + $0x68] sm:$0xff] %v666_v58 }
 0x213   : > { %1033 = shalt.err (!%p1030_p3)
}
 0x214   : > { %s1034_s6 = scalar_lea.hbm %s1270_s23, 2048  ;;  %s1038_s7 = scalar_lea.hbm %s1324_s4, 4096 }
 0x215   : > { %p1035_p4 = scmp.ne.s32.totalorder %s1270_s23, %s1034_s6  ;;  %p1039_p9 = scmp.lt.u32.totalorder %s1270_s23, %s1324_s4 }
 0x216   : > { %p1040_p10 = scmp.lt.u32.totalorder %s1038_s7, %s1034_s6  ;;  %p1042_p12 = scmp.lt.u32.totalorder %s1034_s6, %s1270_s23 }
 0x217   : > { %p1036_p7 = pnand %p1035_p4, %p1150_p5 }
 0x218   : > { %p1041_p11 = por %p1040_p10, %p1039_p9 }
 0x219   : > { %p1037_p8 = pneg %p1036_p7 }
 0x21a   : > { %p1043_p13 = por %p1042_p12, %p1041_p11 }
 0x21c   : > { %p1044_p0 = pnand %p1043_p13, %p1037_p8 }
 0x21e   : > { %1047 = shalt.err (!%p1044_p0)
}
 0x21f   : > { %s1085_s11 = smov 128   ;;  %s1086_s12 = smov 8  }
 0x220   : > { %937 = dma.vmem_to_hbm [thread:$0]  (%p1150_p5), %s1272_s14, 2048, %s1270_s23, %s1279_s19, %s1085_s11, %s1085_s11, %s1086_s12  }
 0x221 PF: > { %p943_p1 = scmp.ge.s32.totalorder %s1082_s18, 2  ;;  %s722_s13 = sand.u32 1, %s1070_s15  }
 0x222   : > { %s723_s20 = scalar_lea.sflag [#allocation3], %s722_s13 }
 0x223   : > { %p940_p2 = pnand %p943_p1, %p1154_p6 }
 0x225   : > { %1065 = dma.done.wait (!%p940_p2), %s723_s20, 2048  }
 0x226   : > { %1067 = vsyncadd (!%p940_p2), %s723_s20, 4294965248  ;;  %p14_p3 = scmp.ge.s32.totalorder %s1137_s21, 4   ;;  %s1327_s15 = smov %s1074_s16 }
 0x227   : > { %s1328_s16 = smov %s1078_s17  ;;  %s1329_s17 = smov %s1148_s24 }
 0x228   : > { %s1330_s18 = smov %s1137_s21  ;;  %16 = sbr.rel (!%p14_p3) target bundleno = 3 (0x3), region = 71 }
 0x22f   :  { %728 = vsyncpa [#allocation3], 1 }
 0x230   :  { %730 = vsyncpa [#allocation3 + $0x1], 1 }

</bundles_post_ra>
